<compile_context>
chip_gen: v5e
topology: v5e:2x2
jax: 0.10.0
libtpu: 0.0.40
codegen_flags: <defaults>
</compile_context>

<pallas_src>
import math

import jax
import jax.numpy as jnp
from jax.experimental import pallas as pl
from jax.experimental.pallas import tpu as pltpu


def _round_up(a, m):
    return (a + m - 1) // m * m


def _encoder_kernel(x_ref,                  # (F, TR)   feature-major rows; mask = last row
                    w0_ref, b0_ref,         # (h0, F) / (h0, 1)  t-row folded into b0, mask col zero
                    w1_ref, b1_ref,         # (h1, h0) / (h1, 1)
                    w2_ref, b2_ref,         # (out, h1) / (out, 1)  mean: 1/denom pre-folded
                    gsum_ref, gbc_ref,      # (TR, TB) / (TB, TR)  0/1 group matrices
                    o_ref):                 # (out, TR)
    f = x_ref.shape[0]
    x = x_ref[...]                          # compute dtype (f32 or bf16)
    cd = x.dtype
    m = x[f - 1:f, :].astype(jnp.float32)   # (1, TR) mask row

    # DiffeqMLP, feature-major: h^T = tanh(W^T x^T + b); f32 accumulation.
    h = jnp.tanh(jnp.dot(w0_ref[...], x, preferred_element_type=jnp.float32)
                 + b0_ref[...])
    h = jnp.tanh(jnp.dot(w1_ref[...], h.astype(cd), preferred_element_type=jnp.float32)
                 + b1_ref[...])
    e = jnp.dot(w2_ref[...], h.astype(cd), preferred_element_type=jnp.float32) + b2_ref[...]
    e = e * m                               # set_emb(t, x) * mask            (out, TR)

    # Exclusive sum pooling per batch: group-sum then broadcast-back, both on
    # the MXU (kept f32 so the f32 path stays exact).
    s = jnp.dot(e, gsum_ref[...], preferred_element_type=jnp.float32)        # (out, TB)
    sb = jnp.dot(s, gbc_ref[...], preferred_element_type=jnp.float32)        # (out, TR)
    o_ref[...] = (sb - e).astype(o_ref.dtype)
    # TODO(synk): pooling == 'max' (torch.topk-based exclusive max) not implemented.


def zero_trace_equivariant_encoder(t, x, mask, params, pooling="mean",
                                   compute_dtype=jnp.float32, target_rows=2048):
    """x: [B, N, in_dim] f32, mask: [B, N, 1] (or None), t: scalar.

    Returns [B, N, in_dim, out_dim], matching the PyTorch module
    (y.unsqueeze(-2).repeat_interleave(in_dim, dim=-2)).
    """
    assert pooling in ("mean", "sum"), "max pooling left as TODO(synk)"
    w0, b0, w1, b1, w2, b2 = params         # weights stored (fan_in, fan_out)
    B, N, in_dim = x.shape
    h0 = w0.shape[1]
    h1 = w1.shape[1]
    out_dim = w2.shape[1]
    assert w0.shape[0] == in_dim + 1        # [t, x] concat feeds layer 0
    F = in_dim + 1                          # x features + merged mask row

    if mask is None:
        mask = jnp.ones(x.shape[:-1] + (1,), x.dtype)
    else:
        mask = mask[..., 0:1]

    # ---- fold scalars into the weights ----
    # t-row of W0 -> b0; extra all-zero W0 column for the merged mask row.
    w0T = jnp.concatenate([w0[1:, :].T, jnp.zeros((h0, 1), w0.dtype)], axis=1)   # (h0, F)
    b0c = (b0 + jnp.float32(t) * w0[0]).reshape(h0, 1).astype(jnp.float32)
    b1c = b1.reshape(h1, 1).astype(jnp.float32)
    if pooling == "mean":
        # PyTorch quirk: torch.max(N-1, ones)[0] uses batch 0's valid count for
        # every batch.  (s - e)/c == s' - e' with e' = e*c, so fold c into
        # W2/b2 once instead of a per-row multiply in the kernel.
        n0 = jnp.sum(mask[0, :, 0])
        c = (1.0 / jnp.maximum(n0 - 1.0, 1.0)).astype(jnp.float32)
        w2_eff, b2_eff = w2 * c, b2 * c
    else:
        w2_eff, b2_eff = w2, b2
    w1T = w1.T
    w2T = w2_eff.T                                                # (out_dim, h1)
    b2c = b2_eff.reshape(out_dim, 1).astype(jnp.float32)

    # ---- tiling: pad N to a multiple of 8; pad B so tb is perf-chosen ----
    Np = _round_up(N, 8)
    granule = 128 // math.gcd(Np, 128)          # keeps TR = tb*Np a multiple of 128
    tb = max(1, min(max(1, target_rows // Np), max(1, -(-B // 2))))   # >= 2 steps when B >= 2
    tb = _round_up(tb, granule)
    tb8 = _round_up(max(1, -(-B // 8)), granule)                      # prefer >= 8 steps
    if tb8 * Np >= 1024:
        tb = min(tb, tb8)
    num_steps = max(1, -(-B // tb))
    if B >= 2:
        num_steps = max(num_steps, 2)           # v7x: give both TensorCores work
    B_pad = num_steps * tb
    TR = tb * Np
    R = B_pad * Np

    # ---- feature-major inputs (mask merged as the last feature row) ----
    xe = jnp.concatenate([x, mask.astype(x.dtype)], axis=-1)          # (B, N, F)
    xe = jnp.pad(xe, ((0, B_pad - B), (0, Np - N), (0, 0)))
    xT = xe.reshape(B_pad * Np, F).T.astype(compute_dtype)            # (F, R)

    # 0/1 group matrices for the per-batch exclusive sum (column r belongs to
    # local batch r // Np within a step).
    grp = jnp.arange(TR, dtype=jnp.int32) // Np
    gsum = (grp[:, None] == jnp.arange(tb, dtype=jnp.int32)[None, :]).astype(jnp.float32)  # (TR, tb)
    gbc = gsum.T                                                       # (tb, TR)

    w0T = w0T.astype(compute_dtype)
    w1T = w1T.astype(compute_dtype)
    w2T = w2T.astype(compute_dtype)

    # ---- VMEM budget from (8,128)-padded, double-buffered block sizes ----
    def padded_bytes(shape, itemsize):
        s = (1,) * (2 - len(shape)) + tuple(shape)
        lead = 1
        for d in s[:-2]:
            lead *= d
        return lead * _round_up(s[-2], 8) * _round_up(s[-1], 128) * itemsize

    cb = jnp.dtype(compute_dtype).itemsize
    vmem = 2 * (padded_bytes((F, TR), cb) + padded_bytes((out_dim, TR), 4)
                + padded_bytes((TR, tb), 4) + padded_bytes((tb, TR), 4)
                + padded_bytes((h0, F), cb) + padded_bytes((h1, h0), cb)
                + padded_bytes((out_dim, h1), cb)
                + padded_bytes((h0, 1), 4) + padded_bytes((h1, 1), 4)
                + padded_bytes((out_dim, 1), 4))
    vmem_limit = int(min(vmem * 1.5 + (8 << 20), 56 << 20))

    grid_spec = pltpu.PrefetchScalarGridSpec(
        num_scalar_prefetch=0,
        grid=(num_steps,),
        in_specs=[
            pl.BlockSpec((F, TR), lambda i: (0, i)),            # xT (mask = last row)
            pl.BlockSpec((h0, F), lambda i: (0, 0)),            # W0^T (zero mask column)
            pl.BlockSpec((h0, 1), lambda i: (0, 0)),            # b0 + t * w0[0]
            pl.BlockSpec((h1, h0), lambda i: (0, 0)),           # W1^T
            pl.BlockSpec((h1, 1), lambda i: (0, 0)),            # b1
            pl.BlockSpec((out_dim, h1), lambda i: (0, 0)),      # W2^T (mean: * 1/denom)
            pl.BlockSpec((out_dim, 1), lambda i: (0, 0)),       # b2   (mean: * 1/denom)
            pl.BlockSpec((TR, tb), lambda i: (0, 0)),           # group-sum matrix
            pl.BlockSpec((tb, TR), lambda i: (0, 0)),           # broadcast-back matrix
        ],
        out_specs=pl.BlockSpec((out_dim, TR), lambda i: (0, i)),
    )

    yT = pl.pallas_call(
        _encoder_kernel,
        out_shape=jax.ShapeDtypeStruct((out_dim, R), jnp.float32),
        grid_spec=grid_spec,
        compiler_params=pltpu.CompilerParams(
            dimension_semantics=("parallel",),
            vmem_limit_bytes=vmem_limit),
    )(xT, w0T, b0c, w1T, b1c, w2T, b2c, gsum, gbc)

    # Back to batch-major, drop padding; repeat_interleave over in_dim is a
    # free broadcast (the kernel never writes the in_dim-redundant copies).
    y = yT.T.reshape(B_pad, Np, out_dim)[:B, :N]
    return jnp.broadcast_to(y[:, :, None, :], (B, N, in_dim, out_dim))


def reference_forward(t, x, mask, params, pooling="mean"):
    """Plain-JAX reference mirroring the PyTorch forward (for verification)."""
    w0, b0, w1, b1, w2, b2 = params
    tcol = jnp.full(x.shape[:-1] + (1,), t, x.dtype)
    h = jnp.concatenate([tcol, x], axis=-1)
    h = jnp.tanh(h @ w0 + b0)
    h = jnp.tanh(h @ w1 + b1)
    e = (h @ w2 + b2) * mask
    s = jnp.sum(e, axis=-2, keepdims=True)
    y = s - e
    if pooling == "mean":
        ncount = jnp.sum(mask, axis=-2, keepdims=True)            # (B,1,1)
        denom = jnp.maximum(ncount - 1.0, 1.0)[0]                 # torch [...][0] quirk
        y = y / denom
    return jnp.repeat(y[..., None, :], x.shape[-1], axis=-2)


if __name__ == "__main__":
    B, N, in_dim = 2, 8, 4
    hidden_dims = [32, 32]
    out_dim = 8
    t = 0.5

    key = jax.random.PRNGKey(0)
    kx, kp = jax.random.split(key)

    x = jax.random.normal(kx, (B, N, in_dim), jnp.float32)
    mask = jnp.ones((B, N, 1), jnp.float32)
    mask = mask.at[1, -2:, 0].set(0.0)          # drop two set elements in batch 1

    # Deterministic Linear init (torch-style uniform(-1/sqrt(fan_in), 1/sqrt(fan_in))).
    dims = [in_dim + 1] + hidden_dims + [out_dim]
    keys = jax.random.split(kp, 2 * (len(dims) - 1))
    params = []
    for i in range(len(dims) - 1):
        lim = float(dims[i]) ** -0.5
        w = jax.random.uniform(keys[2 * i], (dims[i], dims[i + 1]), jnp.float32, -lim, lim)
        b = jax.random.uniform(keys[2 * i + 1], (dims[i + 1],), jnp.float32, -lim, lim)
        params += [w, b]

    # Exact (f32) path: tight tolerance against the plain-JAX reference.
    for pooling in ("mean", "sum"):
        out = zero_trace_equivariant_encoder(t, x, mask, params, pooling,
                                             compute_dtype=jnp.float32)
        out = jax.block_until_ready(out)
        ref = reference_forward(t, x, mask, params, pooling)
        assert out.shape == (B, N, in_dim, out_dim)
        assert jnp.allclose(out, ref, atol=1e-4, rtol=1e-4), (
            pooling, float(jnp.max(jnp.abs(out - ref))))

    # bf16 MXU path (v6e/v7x recommendation; f32 accumulation kept): loose
    # sanity check only, since the reference stays f32.
    out_bf = zero_trace_equivariant_encoder(t, x, mask, params, "mean",
                                            compute_dtype=jnp.bfloat16)
    out_bf = jax.block_until_ready(out_bf)
    ref = reference_forward(t, x, mask, params, "mean")
    assert out_bf.shape == (B, N, in_dim, out_dim)
    assert jnp.allclose(out_bf, ref, atol=2.5e-1, rtol=2.5e-1), (
        "bf16", float(jnp.max(jnp.abs(out_bf - ref))))

    print("KERNEL_OK")
</pallas_src>

<mosaic_0001>
module attributes {stable_mosaic.version = 11 : i64} {
  func.func @_encoder_kernel(%arg0: i32, %arg1: memref<5x128xf32, #tpu.memory_space<vmem>>, %arg2: memref<32x5xf32, #tpu.memory_space<vmem>>, %arg3: memref<32x1xf32, #tpu.memory_space<vmem>>, %arg4: memref<32x32xf32, #tpu.memory_space<vmem>>, %arg5: memref<32x1xf32, #tpu.memory_space<vmem>>, %arg6: memref<8x32xf32, #tpu.memory_space<vmem>>, %arg7: memref<8x1xf32, #tpu.memory_space<vmem>>, %arg8: memref<128x16xf32, #tpu.memory_space<vmem>>, %arg9: memref<16x128xf32, #tpu.memory_space<vmem>>, %arg10: memref<8x128xf32, #tpu.memory_space<vmem>>) attributes {dimension_semantics = [#tpu.dimension_semantics<parallel>], iteration_bounds = array<i64: 2>, scalar_prefetch = 0 : i64, scratch_operands = 0 : i64, tpu.core_type = #tpu.core_type<tc>, window_params = [{transform_indices = @transform_0, window_bounds = array<i64: 5, 128>}, {pipeline_mode = #tpu.pipeline_mode<synchronous>, transform_indices = @transform_1, window_bounds = array<i64: 32, 5>}, {pipeline_mode = #tpu.pipeline_mode<synchronous>, transform_indices = @transform_2, window_bounds = array<i64: 32, 1>}, {pipeline_mode = #tpu.pipeline_mode<synchronous>, transform_indices = @transform_3, window_bounds = array<i64: 32, 32>}, {pipeline_mode = #tpu.pipeline_mode<synchronous>, transform_indices = @transform_4, window_bounds = array<i64: 32, 1>}, {pipeline_mode = #tpu.pipeline_mode<synchronous>, transform_indices = @transform_5, window_bounds = array<i64: 8, 32>}, {pipeline_mode = #tpu.pipeline_mode<synchronous>, transform_indices = @transform_6, window_bounds = array<i64: 8, 1>}, {pipeline_mode = #tpu.pipeline_mode<synchronous>, transform_indices = @transform_7, window_bounds = array<i64: 128, 16>}, {pipeline_mode = #tpu.pipeline_mode<synchronous>, transform_indices = @transform_8, window_bounds = array<i64: 16, 128>}, {transform_indices = @transform_9, window_bounds = array<i64: 8, 128>}]} {
    %c0 = arith.constant 0 : index
    %c0_0 = arith.constant 0 : index
    %0 = vector.load %arg1[%c0, %c0_0] : memref<5x128xf32, #tpu.memory_space<vmem>>, vector<5x128xf32>
    %1 = vector.extract_strided_slice %0 {offsets = [4, 0], sizes = [1, 128], strides = [1, 1]} : vector<5x128xf32> to vector<1x128xf32>
    %c0_1 = arith.constant 0 : index
    %c0_2 = arith.constant 0 : index
    %2 = vector.load %arg2[%c0_1, %c0_2] : memref<32x5xf32, #tpu.memory_space<vmem>>, vector<32x5xf32>
    %cst = arith.constant dense<0.000000e+00> : vector<32x128xf32>
    %3 = tpu.matmul %2, %0, %cst {dimension_numbers = #tpu.dot_dimension_numbers<[1], [0], [0], [1], [0, 0, 1, 1], [], []>} : vector<32x5xf32>, vector<5x128xf32>, vector<32x128xf32> -> vector<32x128xf32>
    %c0_3 = arith.constant 0 : index
    %c0_4 = arith.constant 0 : index
    %4 = vector.load %arg3[%c0_3, %c0_4] : memref<32x1xf32, #tpu.memory_space<vmem>>, vector<32x1xf32>
    %5 = vector.broadcast %4 : vector<32x1xf32> to vector<32x128xf32>
    %6 = arith.addf %3, %5 : vector<32x128xf32>
    %7 = math.tanh %6 : vector<32x128xf32>
    %c0_5 = arith.constant 0 : index
    %c0_6 = arith.constant 0 : index
    %8 = vector.load %arg4[%c0_5, %c0_6] : memref<32x32xf32, #tpu.memory_space<vmem>>, vector<32x32xf32>
    %cst_7 = arith.constant dense<0.000000e+00> : vector<32x128xf32>
    %9 = tpu.matmul %8, %7, %cst_7 {dimension_numbers = #tpu.dot_dimension_numbers<[1], [0], [0], [1], [0, 0, 1, 1], [], []>} : vector<32x32xf32>, vector<32x128xf32>, vector<32x128xf32> -> vector<32x128xf32>
    %c0_8 = arith.constant 0 : index
    %c0_9 = arith.constant 0 : index
    %10 = vector.load %arg5[%c0_8, %c0_9] : memref<32x1xf32, #tpu.memory_space<vmem>>, vector<32x1xf32>
    %11 = vector.broadcast %10 : vector<32x1xf32> to vector<32x128xf32>
    %12 = arith.addf %9, %11 : vector<32x128xf32>
    %13 = math.tanh %12 : vector<32x128xf32>
    %c0_10 = arith.constant 0 : index
    %c0_11 = arith.constant 0 : index
    %14 = vector.load %arg6[%c0_10, %c0_11] : memref<8x32xf32, #tpu.memory_space<vmem>>, vector<8x32xf32>
    %cst_12 = arith.constant dense<0.000000e+00> : vector<8x128xf32>
    %15 = tpu.matmul %14, %13, %cst_12 {dimension_numbers = #tpu.dot_dimension_numbers<[1], [0], [0], [1], [0, 0, 1, 1], [], []>} : vector<8x32xf32>, vector<32x128xf32>, vector<8x128xf32> -> vector<8x128xf32>
    %c0_13 = arith.constant 0 : index
    %c0_14 = arith.constant 0 : index
    %16 = vector.load %arg7[%c0_13, %c0_14] : memref<8x1xf32, #tpu.memory_space<vmem>>, vector<8x1xf32>
    %17 = vector.broadcast %16 : vector<8x1xf32> to vector<8x128xf32>
    %18 = arith.addf %15, %17 : vector<8x128xf32>
    %19 = vector.broadcast %1 : vector<1x128xf32> to vector<8x128xf32>
    %20 = arith.mulf %18, %19 : vector<8x128xf32>
    %c0_15 = arith.constant 0 : index
    %c0_16 = arith.constant 0 : index
    %21 = vector.load %arg8[%c0_15, %c0_16] : memref<128x16xf32, #tpu.memory_space<vmem>>, vector<128x16xf32>
    %cst_17 = arith.constant dense<0.000000e+00> : vector<8x16xf32>
    %22 = tpu.matmul %20, %21, %cst_17 {dimension_numbers = #tpu.dot_dimension_numbers<[1], [0], [0], [1], [0, 0, 1, 1], [], []>} : vector<8x128xf32>, vector<128x16xf32>, vector<8x16xf32> -> vector<8x16xf32>
    %c0_18 = arith.constant 0 : index
    %c0_19 = arith.constant 0 : index
    %23 = vector.load %arg9[%c0_18, %c0_19] : memref<16x128xf32, #tpu.memory_space<vmem>>, vector<16x128xf32>
    %cst_20 = arith.constant dense<0.000000e+00> : vector<8x128xf32>
    %24 = tpu.matmul %22, %23, %cst_20 {dimension_numbers = #tpu.dot_dimension_numbers<[1], [0], [0], [1], [0, 0, 1, 1], [], []>} : vector<8x16xf32>, vector<16x128xf32>, vector<8x128xf32> -> vector<8x128xf32>
    %25 = arith.subf %24, %20 : vector<8x128xf32>
    %c0_21 = arith.constant 0 : index
    %c0_22 = arith.constant 0 : index
    %26 = vector.load %arg10[%c0_21, %c0_22] : memref<8x128xf32, #tpu.memory_space<vmem>>, vector<8x128xf32>
    tpu.vector_store %arg10[%c0_21, %c0_22], %25 {strides = array<i32>} : memref<8x128xf32, #tpu.memory_space<vmem>>, vector<8x128xf32>,
    return
  }
  func.func @transform_0(%arg0: i32) -> (i32, i32) {
    %c0_i32 = arith.constant 0 : i32
    %c0_i32_0 = arith.constant 0 : i32
    return %c0_i32, %arg0 : i32, i32
  }
  func.func @transform_1(%arg0: i32) -> (i32, i32) {
    %c0_i32 = arith.constant 0 : i32
    %c0_i32_0 = arith.constant 0 : i32
    %c0_i32_1 = arith.constant 0 : i32
    return %c0_i32, %c0_i32_0 : i32, i32
  }
  func.func @transform_2(%arg0: i32) -> (i32, i32) {
    %c0_i32 = arith.constant 0 : i32
    %c0_i32_0 = arith.constant 0 : i32
    %c0_i32_1 = arith.constant 0 : i32
    return %c0_i32, %c0_i32_0 : i32, i32
  }
  func.func @transform_3(%arg0: i32) -> (i32, i32) {
    %c0_i32 = arith.constant 0 : i32
    %c0_i32_0 = arith.constant 0 : i32
    %c0_i32_1 = arith.constant 0 : i32
    return %c0_i32, %c0_i32_0 : i32, i32
  }
  func.func @transform_4(%arg0: i32) -> (i32, i32) {
    %c0_i32 = arith.constant 0 : i32
    %c0_i32_0 = arith.constant 0 : i32
    %c0_i32_1 = arith.constant 0 : i32
    return %c0_i32, %c0_i32_0 : i32, i32
  }
  func.func @transform_5(%arg0: i32) -> (i32, i32) {
    %c0_i32 = arith.constant 0 : i32
    %c0_i32_0 = arith.constant 0 : i32
    %c0_i32_1 = arith.constant 0 : i32
    return %c0_i32, %c0_i32_0 : i32, i32
  }
  func.func @transform_6(%arg0: i32) -> (i32, i32) {
    %c0_i32 = arith.constant 0 : i32
    %c0_i32_0 = arith.constant 0 : i32
    %c0_i32_1 = arith.constant 0 : i32
    return %c0_i32, %c0_i32_0 : i32, i32
  }
  func.func @transform_7(%arg0: i32) -> (i32, i32) {
    %c0_i32 = arith.constant 0 : i32
    %c0_i32_0 = arith.constant 0 : i32
    %c0_i32_1 = arith.constant 0 : i32
    return %c0_i32, %c0_i32_0 : i32, i32
  }
  func.func @transform_8(%arg0: i32) -> (i32, i32) {
    %c0_i32 = arith.constant 0 : i32
    %c0_i32_0 = arith.constant 0 : i32
    %c0_i32_1 = arith.constant 0 : i32
    return %c0_i32, %c0_i32_0 : i32, i32
  }
  func.func @transform_9(%arg0: i32) -> (i32, i32) {
    %c0_i32 = arith.constant 0 : i32
    %c0_i32_0 = arith.constant 0 : i32
    return %c0_i32, %arg0 : i32, i32
  }
}

</mosaic_0001>

<bundles_post_ra>
// kernel: tpu_custom_call.1
= control target key start
LH: loop header
LB: loop body
LE: loop exit
PB: predicated region body
PF: predicated region fallthrough
CT: control target
= control target key end

     0   :  { %s1053_s0 = inlined_call_operand.vmem [shape: f32[5,256], index: 0, kind: input, shape index: {}]   ;;  %s1054_s1 = inlined_call_operand.vmem [shape: f32[32,5], index: 1, kind: input, shape index: {}]   ;;  %s1055_s2 = inlined_call_operand.vmem [shape: f32[32,1], index: 2, kind: input, shape index: {}]   ;;  %s1056_s3 = inlined_call_operand.vmem [shape: f32[32,32], index: 3, kind: input, shape index: {}]   ;;  %s1057_s4 = inlined_call_operand.vmem [shape: f32[32,1], index: 4, kind: input, shape index: {}]   ;;  %s1058_s5 = inlined_call_operand.vmem [shape: f32[8,32], index: 5, kind: input, shape index: {}]   ;;  %s1059_s6 = inlined_call_operand.vmem [shape: f32[8,1], index: 6, kind: input, shape index: {}]   ;;  %s1060_s7 = inlined_call_operand.vmem [shape: f32[128,16], index: 7, kind: input, shape index: {}]   ;;  %s1061_s8 = inlined_call_operand.vmem [shape: f32[16,128], index: 8, kind: input, shape index: {}]   ;;  %s1062_s9 = inlined_call_operand.hbm [shape: f32[8,256], index: 9, kind: output, shape index: {}]  }
   0x1   :  { %1063 = sst [smem:[#allocation5_spill]] %s1053_s0 }
   0x2   :  { %14 = vsyncpa [#allocation3], 0 }
   0x3   :  { %16 = vsyncpa [#allocation3 + $0x1], 0  ;;  %s847_s30 = smov 0   ;;  %s849_s10 = smov 0  }
   0x4   :  { %s851_s11 = smov 0   ;;  %s853_s12 = smov 0  }
   0x5 LB: > { %s868_s13 = sadd.s32 4294967295, %s794_s12   ;;  %s652_s14 = sadd.s32 4294967294, %s794_s12   ;;  %s794_s12 = sphi %s853_s12, %s1070_s12   ;;  %s790_s11 = sphi %s851_s11, %s1069_s11   ;;  %s786_s10 = sphi %s849_s10, %s1068_s10   ;;  %s782_s30 = sphi %s847_s30, %s1067_s30  }
   0x6   : > { %s872_s15 = sadd.s32 1, %s794_s12   ;;  %s223_s16 = sadd.s32 1, %s790_s11 }
   0x7   : > { %s220_s17 = ssub.s32 %s794_s12, %s872_s15  ;;  %p233_p0 = scmp.ne.s32.totalorder %s790_s11, %s786_s10 }
   0x8   : > { %p221_p1 = scmp.eq.s32.totalorder %s220_s17, 0  ;;  %p234_p2 = scmp.eq.s32.totalorder %s868_s13, 1 }
   0x9   : > { %p239_p3 = scmp.ne.s32.totalorder %s786_s10, %s782_s30  ;;  %p240_p4 = scmp.eq.s32.totalorder %s652_s14, 1 }
   0xa   : > { %s883_s18 = scalar_select %p221_p1, %s790_s11, %s223_s16  }
   0xb   : > { %p885_p5 = por %p234_p2, %p233_p0  ;;  %p889_p6 = por %p240_p4, %p239_p3 }
   0xc   : > { %p655_p7 = scmp.ge.s32.totalorder %s794_s12, 1  ;;  %p289_p8 = scmp.lt.s32.totalorder %s794_s12, 3 }
   0xe   : > { %p290_p9 = pnand %p655_p7, %p289_p8 }
   0xf   : > { %p324_p10 = scmp.lt.s32.totalorder (!%p290_p9), %s868_s13, 1  ;;  %s1066_s0 = sld [smem:[#allocation5_spill]] (!%p290_p9) }
  0x10   : > { %293 = sbr.rel (%p290_p9) target bundleno = 764 (0x2fc), region = 56  ;;  %s670_s28 = sshll.u32 (!%p290_p9), %s868_s13, 3 }
  0x11   : > { %s588_s16 = scalar_lea.hbm (!%p290_p9), %s1062_s9, %s670_s28  ;;  %s752_s28 = scalar_lea.hbm (!%p290_p9), %s1062_s9, 16 }
  0x12   : > { %s592_s22 = sshll.u32 (!%p290_p9), %s588_s16, 4  ;;  %s593_s22 = int_to_ptr.hbm [resolvable:$true] %s592_s22 }
  0x13   : > { %s746_s24 = sshra.s32 (!%p290_p9), %s593_s22, 4  ;;  %s747_s24 = int_to_ptr.hbm [resolvable:$true] %s746_s24 }
  0x14   : > { %p753_p0 = scmp.lt.s32.totalorder (!%p290_p9), %s747_s24, %s1062_s9 }
  0x15   : > { %v334_v0 = vld [vmem:[%s1055_s2 + $0x8] sm:$0xff]  ;;  %v796_v1 = vmov 0   ;;  %v336_v2 = vld [vmem:[%s1055_s2 + $0x18] sm:$0xff]  ;;  %s325_s25 = scalar_select %p324_p10, %s868_s13, 1  ;;  %vm370_vm0 = vcmask 1044480   ;;  %v329_v3 = vld [vmem:[%s1054_s1] sm:$0xff] }
  0x16   : > { %714 = vset.pattern.permute.xlu1 %v796_v1  ;;  %713 = vset.pattern.permute.xlu0 %v796_v1  ;;  %vm357_vm1 = vcmask 39936   ;;  %v333_v5 = vld [vmem:[%s1055_s2] sm:$0xff]  ;;  %v335_v6 = vld [vmem:[%s1055_s2 + $0x10] sm:$0xff]  ;;  %v330_v7 = vld [vmem:[%s1054_s1 + $0x8] sm:$0xff]  ;;  %vm435_vm2 = vcmask 261120   ;;  %vm551_vm3 = vcmask 130048  }
  0x17   : > { %344 = vperm.xlu1 %714, %v334_v0   ;;  %354 = vperm.xlu0 %713, %v336_v2   ;;  %s657_s26 = sshll.u32 %s325_s25, 3  ;;  %v412_v8 = vld [vmem:[%s1057_s4 + $0x8] sm:$0xff]  ;;  %v411_v9 = vld [vmem:[%s1057_s4] sm:$0xff]  ;;  %v331_v10 = vld [vmem:[%s1054_s1 + $0x10] sm:$0xff]  ;;  %s748_s25 = scalar_lea.hbm %s747_s24, 8 }
  0x18   : > { %715 = vset.pattern.permute.xlu2 %v796_v1  ;;  %s327_s29 = scalar_lea.vmem %s1066_s0, %s657_s26  ;;  %v332_v11 = vld [vmem:[%s1054_s1 + $0x18] sm:$0xff]  ;;  %v407_v28 = vld [vmem:[%s1056_s3] sm:$0xff]  ;;  %v413_v30 = vld [vmem:[%s1057_s4 + $0x10] sm:$0xff]  ;;  %s321_s26 = sand.u32 1, %s786_s10  }
  0x19   : > { %v909_v4 = vld [vmem:[%s327_s29] sm:$0x1f]  ;;  %v414_v25 = vld [vmem:[%s1057_s4 + $0x18] sm:$0xff]  ;;  %v408_v31 = vld [vmem:[%s1056_s3 + $0x8] sm:$0xff]  ;;  %s656_s27 = sshll.u32 %s321_s26, 3  ;;  %s578_s23 = scalar_lea.sflag [#allocation3], %s321_s26 }
  0x1a   : > { %658 = vmatpush.msk.msra.mxu0 %vm370_vm0, %v909_v4  ;;  %432 = vperm.xlu2 %715, %v414_v25   ;;  %v482_v32 = vld [vmem:[%s1059_s6] sm:$0xff]  ;;  %v409_v33 = vld [vmem:[%s1056_s3 + $0x10] sm:$0xff]  ;;  %v410_v34 = vld [vmem:[%s1056_s3 + $0x18] sm:$0xff]  ;;  %s323_s17 = scalar_lea.vmem [#allocation2], %s656_s27  ;;  %p749_p11 = scmp.ne.s32.totalorder %s747_s24, %s748_s25 }
  0x1b   : > { %659 = vmatmul.msk.f32.vlgmr.msra.gmra.mxu0 %vm357_vm1, %v329_v3  ;;  %v528_v37 = vld [vmem:[%s1060_s7 + $0x78] sm:$0xff]  ;;  %v527_v38 = vld [vmem:[%s1060_s7 + $0x70] sm:$0xff]  ;;  %v526_v39 = vld [vmem:[%s1060_s7 + $0x68] sm:$0xff]  ;;  %s590_s21 = sshll.u32 %s323_s17, 4  ;;  %p754_p1 = scmp.lt.s32.totalorder %s752_s28, %s748_s25  ;;  %s591_s21 = int_to_ptr.vmem [resolvable:$true] %s590_s21 }
  0x1c   : > { %529 = vmatpush.msra.mxu3 %v528_v37  ;;  %v525_v40 = vld [vmem:[%s1060_s7 + $0x60] sm:$0xff]  ;;  %v524_v42 = vld [vmem:[%s1060_s7 + $0x58] sm:$0xff]  ;;  %v523_v44 = vld [vmem:[%s1060_s7 + $0x50] sm:$0xff]  ;;  %p750_p12 = pnand %p749_p11, %p885_p5 }
  0x1d   : > { %v522_v45 = vld [vmem:[%s1060_s7 + $0x48] sm:$0xff]  ;;  %v521_v46 = vld [vmem:[%s1060_s7 + $0x40] sm:$0xff]  ;;  %v520_v47 = vld [vmem:[%s1060_s7 + $0x38] sm:$0xff]  ;;  %p755_p2 = por %p754_p1, %p753_p0 }
  0x1e   : > { %530 = vmatpush.msra.mxu3 %v527_v38  ;;  %v519_v52 = vld [vmem:[%s1060_s7 + $0x30] sm:$0xff]  ;;  %v518_v55 = vld [vmem:[%s1060_s7 + $0x28] sm:$0xff]  ;;  %v517_v58 = vld [vmem:[%s1060_s7 + $0x20] sm:$0xff]  ;;  %p751_p13 = pneg %p750_p12 }
  0x1f   : > { %339 = vperm.xlu1 %714, %v333_v5   ;;  %349 = vperm.xlu0 %713, %v335_v6   ;;  %v516_v59 = vld [vmem:[%s1060_s7 + $0x18] sm:$0xff]  ;;  %v481_v63 = vld [vmem:[%s1058_s5] sm:$0xff]  ;;  %v515_v1 = vld [vmem:[%s1060_s7 + $0x10] sm:$0xff] }
  0x20   : > { %531 = vmatpush.msra.mxu3 %v526_v39  ;;  %v514_v2 = vld [vmem:[%s1060_s7 + $0x8] sm:$0xff]  ;;  %v513_v3 = vld [vmem:[%s1060_s7] sm:$0xff]  ;;  %p756_p3 = pnand %p755_p2, %p751_p13 }
  0x21   : > { %v550_v5 = vld [vmem:[%s1061_s8 + $0x8] sm:$0xff]  ;;  %v549_v6 = vld [vmem:[%s1061_s8] sm:$0xff] }
  0x22   : > { %427 = vperm.xlu2 %715, %v413_v30   ;;  %532 = vmatpush.msra.mxu3 %v525_v40 }
  0x23   : > { %660 = vmatmul.msk.f32.gmra.mxu0 %vm357_vm1, %v330_v7  ;;  %v511_v7 = vperm.slane %v909_v4, 4 }
  0x24   : > { %533 = vmatpush.msra.mxu3 %v524_v42 }
  0x26   : > { %534 = vmatpush.msra.mxu3 %v523_v44 }
  0x27   : > { %422 = vperm.xlu0 %713, %v412_v8   ;;  %417 = vperm.xlu1 %714, %v411_v9  }
  0x28   : > { %535 = vmatpush.msra.mxu3 %v522_v45 }
  0x2a   : > { %485 = vperm.xlu2 %715, %v482_v32   ;;  %536 = vmatpush.msra.mxu3 %v521_v46 }
  0x2b   : > { %661 = vmatmul.msk.f32.gmra.mxu0 %vm357_vm1, %v331_v10 }
  0x2c   : > { %537 = vmatpush.msra.mxu3 %v520_v47 }
  0x2e   : > { %538 = vmatpush.msra.mxu3 %v519_v52 }
  0x30   : > { %539 = vmatpush.msra.mxu3 %v518_v55 }
  0x32   : > { %540 = vmatpush.msra.mxu3 %v517_v58 }
  0x33   : > { %662 = vmatmul.msk.f32.gmra.mxu0 %vm357_vm1, %v332_v11 }
  0x34   : > { %541 = vmatpush.msra.mxu3 %v516_v59 }
  0x36   : > { %542 = vmatpush.msra.mxu3 %v515_v1 }
  0x38   : > { %543 = vmatpush.msra.mxu3 %v514_v2 }
  0x3a   : > { %544 = vmatpush.msra.mxu3 %v513_v3 }
  0x74   : > { %v433_v41 = vpop.permute.xlu2 %432 }
  0x7c   : > { %v428_v48 = vpop.permute.xlu2 %427 }
  0x84   : > { %v486_v8 = vpop.permute.xlu2 %485 }
  0x89   : > { %v355_v14 = vpop.permute.xlu0 %354  ;;  %v345_v15 = vpop.permute.xlu1 %344 }
  0x91   : > { %v350_v17 = vpop.permute.xlu0 %349  ;;  %v340_v21 = vpop.permute.xlu1 %339 }
  0x98   : > { %v391_v12 = vpop.f32.mrf.mxu0 }
  0x99   : > { %v392_v23 = vadd.f32 %v391_v12, %v340_v21  ;;  %v423_v53 = vpop.permute.xlu0 %422  ;;  %v418_v56 = vpop.permute.xlu1 %417 }
  0xa0   : > { %v394_v13 = vpop.f32.mrf.mxu0 }
  0xa1   : > { %v395_v22 = vadd.f32 %v394_v13, %v345_v15 }
  0xa8   : > { %v397_v16 = vpop.f32.mrf.mxu0 }
  0xa9   : > { %v398_v19 = vadd.f32 %v397_v16, %v350_v17 }
  0xb0   : > { %v400_v18 = vpop.f32.mrf.mxu0 }
  0xb1   : > { %v401_v20 = vadd.f32 %v400_v18, %v355_v14 }
  0xb3   : > { %716 = vtanh.f32 %v401_v20 }
  0xb4   : > { %718 = vtanh.f32 %v398_v19 }
  0xb5   : > { %720 = vtanh.f32 %v395_v22 }
  0xb6   : > { %722 = vtanh.f32 %v392_v23 }
  0xb9   : > { %v717_v24 = vpop.eup %716 }
  0xba   : > { %460 = vmatpush.msra.mxu1 %v717_v24  ;;  %v719_v26 = vpop.eup %718 }
  0xbb   : > { %v721_v27 = vpop.eup %720 }
  0xbc   : > { %461 = vmatpush.msra.mxu1 %v719_v26  ;;  %v723_v29 = vpop.eup %722 }
  0xbe   : > { %462 = vmatpush.msra.mxu1 %v721_v27 }
  0xc0   : > { %463 = vmatpush.msra.mxu1 %v723_v29 }
  0xc1   : > { %663 = vmatmul.msk.f32.vlgmr.msra.gmra.mxu1 %vm435_vm2, %v407_v28 }
  0xc9   : > { %664 = vmatmul.msk.f32.gmra.mxu1 %vm435_vm2, %v408_v31 }
  0xd1   : > { %665 = vmatmul.msk.f32.gmra.mxu1 %vm435_vm2, %v409_v33 }
  0xd9   : > { %666 = vmatmul.msk.f32.gmra.mxu1 %vm435_vm2, %v410_v34 }
 0x13e   : > { %v465_v35 = vpop.f32.mrf.mxu1 }
 0x13f   : > { %v466_v57 = vadd.f32 %v465_v35, %v418_v56 }
 0x146   : > { %v468_v36 = vpop.f32.mrf.mxu1 }
 0x147   : > { %v469_v54 = vadd.f32 %v468_v36, %v423_v53 }
 0x14e   : > { %v471_v43 = vpop.f32.mrf.mxu1 }
 0x14f   : > { %v472_v50 = vadd.f32 %v471_v43, %v428_v48 }
 0x156   : > { %v474_v49 = vpop.f32.mrf.mxu1 }
 0x157   : > { %v475_v51 = vadd.f32 %v474_v49, %v433_v41 }
 0x159   : > { %724 = vtanh.f32 %v475_v51 }
 0x15a   : > { %726 = vtanh.f32 %v472_v50 }
 0x15b   : > { %728 = vtanh.f32 %v469_v54 }
 0x15c   : > { %730 = vtanh.f32 %v466_v57 }
 0x15f   : > { %v725_v60 = vpop.eup %724 }
 0x160   : > { %503 = vmatpush.msra.mxu2 %v725_v60  ;;  %v727_v61 = vpop.eup %726 }
 0x161   : > { %v729_v62 = vpop.eup %728 }
 0x162   : > { %504 = vmatpush.msra.mxu2 %v727_v61  ;;  %v731_v0 = vpop.eup %730 }
 0x164   : > { %505 = vmatpush.msra.mxu2 %v729_v62 }
 0x166   : > { %506 = vmatpush.msra.mxu2 %v731_v0 }
 0x167   : > { %667 = vmatmul.msk.f32.vlgmr.msra.gmra.mxu2 %vm435_vm2, %v481_v63 }
 0x168   : > { %569 = vmatpush.msrb.mxu2 %v550_v5 }
 0x16a   : > { %570 = vmatpush.msrb.mxu2 %v549_v6 }
 0x1ea   : > { %v508_v9 = vpop.f32.mrf.mxu2 }
 0x1eb   : > { %v509_v10 = vadd.f32 %v508_v9, %v486_v8 }
 0x1ed   : > { %v512_v11 = vmul.f32 %v511_v7, %v509_v10 }
 0x1ef   : > { %545 = vmatmul.f32.vlgmr.msra.gmra.mxu3 %v512_v11 }
 0x272   : > { %v546_v12 = vpop.f32.mrf.mxu3 }
 0x273   : > { %668 = vmatmul.msk.f32.vlgmr.msrb.gmra.mxu2 %vm551_vm3, %v546_v12 }
 0x2f6   : > { %v572_v4 = vpop.f32.mrf.mxu2 }
 0x2f7   : > { %v575_v13 = vsub.f32 %v572_v4, %v512_v11 }
 0x2f9   : > { %576 = vst [vmem:[%s323_s17] sm:$0xff] %v575_v13 }
 0x2fa   : > { %759 = shalt.err (!%p756_p3)
}
 0x2fb   : > { %673 = dma.vmem_to_hbm [thread:$0]  (%p885_p5), %s591_s21, 128, %s593_s22, %s578_s23  }
 0x2fc PF: > { %p679_p4 = scmp.ge.s32.totalorder %s794_s12, 2  ;;  %s604_s26 = sand.u32 1, %s782_s30  }
 0x2fd   : > { %s605_s0 = scalar_lea.sflag [#allocation3], %s604_s26 }
 0x2fe   : > { %p676_p7 = pnand %p679_p4, %p889_p6 }
 0x300   : > { %p677_p8 = pneg %p676_p7 }
 0x302   : > { %777 = dma.done.wait (%p677_p8), %s605_s0, 128  }
 0x303   : > { %779 = vsyncadd (%p677_p8), %s605_s0, 4294967168  ;;  %p19_p9 = scmp.ge.s32.totalorder %s872_s15, 4   ;;  %s1067_s30 = smov %s786_s10 }
 0x304   : > { %s1068_s10 = smov %s790_s11  ;;  %s1069_s11 = smov %s883_s18 }
 0x305   : > { %s1070_s12 = smov %s872_s15  ;;  %21 = sbr.rel (!%p19_p9) target bundleno = 5 (0x5), region = 91 }
 0x30a   :  { %611 = vsyncpa [#allocation3], 1 }
 0x30b   :  { %613 = vsyncpa [#allocation3 + $0x1], 1 }

</bundles_post_ra>
